<compile_context>
chip_gen: v7x
topology: tpu7x:2x2x1
jax: 0.10.0
libtpu: 0.0.40
codegen_flags: <defaults>
</compile_context>

<pallas_src>
import jax
import jax.numpy as jnp
from jax.experimental import pallas as pl
from jax.experimental.pallas import tpu as pltpu

EPS = 1e-6


def _round_up(n, m):
    return ((n + m - 1) // m) * m


def cln_kernel(x_ref, mem_ref, w1_ref, b1_ref,
               w2g_ref, b2g_ref, w2b_ref, b2b_ref, o_ref):
    x = x_ref[...].astype(jnp.float32)              # (tm, D) f32
    D = x.shape[-1]

    # ---- fused first layers of mlp_gamma & mlp_beta: one MXU pass over mem ----
    mem = mem_ref[...]                              # (tm, M)  bf16 (or f32)
    h = jnp.dot(mem, w1_ref[...],
                preferred_element_type=jnp.float32) + b1_ref[...]   # (tm, 2D) f32
    h = jnp.maximum(h, 0.0)
    h = h.astype(w2g_ref.dtype)                     # back to MXU compute dtype

    # ---- second layers (gamma already folded into b2g, beta into b2b) ----
    dg = jnp.dot(h[:, :D], w2g_ref[...],
                 preferred_element_type=jnp.float32) + b2g_ref[...]  # gamma_hat
    db = jnp.dot(h[:, D:], w2b_ref[...],
                 preferred_element_type=jnp.float32) + b2b_ref[...]  # beta_hat

    # ---- conditional layer norm (all f32) ----
    mean = jnp.mean(x, axis=-1, keepdims=True)
    xc = x - mean
    var = jnp.sum(xc * xc, axis=-1, keepdims=True) / (D - 1)   # torch.std: ddof=1
    # (tm, 1) reciprocal instead of a (tm, D) elementwise divide
    inv = pl.reciprocal(jnp.sqrt(var) + EPS, approx=False)

    o_ref[...] = (dg * xc * inv + db).astype(o_ref.dtype)


def prepare_params(params, compute_dtype=jnp.bfloat16):
    """Host-side prep: fuse first-layer weights, fold gamma/beta, cast matmul
    weights to the MXU compute dtype (biases stay f32)."""
    (w1g, b1g, w2g, b2g, w1b, b1b, w2b, b2b, gamma, beta) = params
    w1 = jnp.concatenate([w1g, w1b], axis=1).astype(compute_dtype)   # (M, 2D)
    b1 = jnp.concatenate([b1g, b1b], axis=1).astype(jnp.float32)     # (1, 2D)
    b2g_f = (b2g + gamma).astype(jnp.float32)                        # fold gamma
    b2b_f = (b2b + beta).astype(jnp.float32)                         # fold beta
    return (w1, b1,
            w2g.astype(compute_dtype), b2g_f,
            w2b.astype(compute_dtype), b2b_f)


def conditional_layer_norm(x, memory, prepped, *, tm=256):
    """x: (B, T, D); memory: (B, T, M); prepped from prepare_params()."""
    B, T, D = x.shape
    M = memory.shape[-1]
    N = B * T

    # Row tile: multiple of 8 (f32 sublane), capped by padded N so small
    # problems don't over-pad.  Pad N up to a tile multiple (zeros are safe:
    # padded rows produce finite garbage and are sliced off below).
    tm_eff = min(tm, _round_up(N, 8))
    N_pad = _round_up(N, tm_eff)

    w1, b1, w2g, b2g, w2b, b2b = prepped

    x_flat = x.reshape(N, D).astype(jnp.float32)
    mem_flat = memory.reshape(N, M).astype(w1.dtype)
    if N_pad != N:
        x_flat = jnp.pad(x_flat, ((0, N_pad - N), (0, 0)))
        mem_flat = jnp.pad(mem_flat, ((0, N_pad - N), (0, 0)))

    # Grid-invariant weight blocks (constant index_map -> DMA'd once, reused).
    # TODO(synk): on v7x, pipeline_mode=pl.Buffered(1) on these would reclaim
    # the redundant second buffer; left at default for portability.
    full = lambda r, c: pl.BlockSpec((r, c), lambda i: (0, 0))

    # TODO(synk): for small d_model (<128) the output last dim forces masked
    # stores; a lane-packed layout would need masked LN stats, so it is not
    # done here.
    out = pl.pallas_call(
        cln_kernel,
        out_shape=jax.ShapeDtypeStruct((N_pad, D), x.dtype),
        grid_spec=pltpu.PrefetchScalarGridSpec(
            num_scalar_prefetch=0,
            grid=(N_pad // tm_eff,),
            in_specs=[
                pl.BlockSpec((tm_eff, D), lambda i: (i, 0)),   # x rows
                pl.BlockSpec((tm_eff, M), lambda i: (i, 0)),   # memory rows
                full(M, 2 * D), full(1, 2 * D),                # fused L1 (gamma|beta)
                full(D, D), full(1, D),                        # mlp_gamma L2 (+gamma)
                full(D, D), full(1, D),                        # mlp_beta  L2 (+beta)
            ],
            out_specs=pl.BlockSpec((tm_eff, D), lambda i: (i, 0)),
        ),
        compiler_params=pltpu.CompilerParams(
            dimension_semantics=("parallel",),
            vmem_limit_bytes=48 * 1024 * 1024,
        ),
    )(x_flat, mem_flat, w1, b1, w2g, b2g, w2b, b2b)

    return out[:N].reshape(B, T, D)


# ---------------------------------------------------------------------------
# Init + references
# ---------------------------------------------------------------------------
def xavier_uniform(key, fan_in, fan_out, dtype=jnp.float32):
    bound = (6.0 / (fan_in + fan_out)) ** 0.5
    # stored as (in, out) so the kernel computes row @ W
    return jax.random.uniform(key, (fan_in, fan_out), dtype, -bound, bound)


def init_params(key, d_model, rm_num_slots, rm_d_model):
    assert d_model == rm_d_model, "original module requires d_model == rm_d_model"
    M = rm_num_slots * rm_d_model
    D = d_model
    k1, k2, k3, k4 = jax.random.split(key, 4)
    bias = lambda: jnp.full((1, D), 0.1, jnp.float32)   # nn.init.constant_(bias, 0.1)
    w1g = xavier_uniform(k1, M, D)
    w2g = xavier_uniform(k2, rm_d_model, rm_d_model)    # Linear(rm_d_model, rm_d_model)
    w1b = xavier_uniform(k3, M, D)
    w2b = xavier_uniform(k4, D, D)
    gamma = jnp.ones((1, D), jnp.float32)
    beta = jnp.zeros((1, D), jnp.float32)
    return (w1g, bias(), w2g, bias(), w1b, bias(), w2b, bias(), gamma, beta)


def reference_prepped(x, memory, prepped):
    """Mirrors the kernel math exactly (same bf16 rounding points), f32 dots."""
    w1, b1, w2g, b2g, w2b, b2b = prepped
    D = x.shape[-1]
    mem = memory.astype(w1.dtype).astype(jnp.float32)
    h = jnp.maximum(mem @ w1.astype(jnp.float32) + b1[0], 0.0)
    h = h.astype(w2g.dtype).astype(jnp.float32)
    dg = h[..., :D] @ w2g.astype(jnp.float32) + b2g[0]
    db = h[..., D:] @ w2b.astype(jnp.float32) + b2b[0]
    mean = x.mean(-1, keepdims=True)
    std = jnp.sqrt(((x - mean) ** 2).sum(-1, keepdims=True) / (D - 1))
    return dg * (x - mean) / (std + EPS) + db


def reference_module(x, memory, params):
    """Pure f32 transcription of the original PyTorch module."""
    (w1g, b1g, w2g, b2g, w1b, b1b, w2b, b2b, gamma, beta) = params
    dg = jnp.maximum(memory @ w1g + b1g[0], 0.0) @ w2g + b2g[0]
    db = jnp.maximum(memory @ w1b + b1b[0], 0.0) @ w2b + b2b[0]
    mean = x.mean(-1, keepdims=True)
    std = jnp.sqrt(((x - mean) ** 2).sum(-1, keepdims=True) / (x.shape[-1] - 1))
    return (gamma[0] + dg) * (x - mean) / (std + EPS) + (beta[0] + db)


if __name__ == "__main__":
    B, T = 2, 8
    d_model = rm_d_model = 32
    rm_num_slots = 3
    M = rm_num_slots * rm_d_model

    key = jax.random.PRNGKey(0)
    kx, km, kp = jax.random.split(key, 3)
    x = jax.random.normal(kx, (B, T, d_model), jnp.float32)
    memory = jax.random.normal(km, (B, T, M), jnp.float32)
    params = init_params(kp, d_model, rm_num_slots, rm_d_model)

    prepped = prepare_params(params, compute_dtype=jnp.bfloat16)

    out = conditional_layer_norm(x, memory, prepped, tm=256)
    out = jax.block_until_ready(out)
    assert out.shape == (B, T, d_model)

    # Strict check vs a reference that uses the same bf16 rounding points.
    ref = reference_prepped(x, memory, prepped)
    assert jnp.allclose(out, ref, atol=1e-4, rtol=1e-4), \
        float(jnp.max(jnp.abs(out - ref)))

    # Loose sanity check vs the pure-f32 module (bf16 weight quantization only).
    ref_f32 = reference_module(x, memory, params)
    assert jnp.allclose(out, ref_f32, atol=0.25, rtol=0.0)

    print("KERNEL_OK")
</pallas_src>

<mosaic_0001>
module attributes {stable_mosaic.version = 11 : i64} {
  func.func @cln_kernel(%arg0: i32, %arg1: memref<16x32xf32, #tpu.memory_space<vmem>>, %arg2: memref<16x96xbf16, #tpu.memory_space<vmem>>, %arg3: memref<96x64xbf16, #tpu.memory_space<vmem>>, %arg4: memref<1x64xf32, #tpu.memory_space<vmem>>, %arg5: memref<32x32xbf16, #tpu.memory_space<vmem>>, %arg6: memref<1x32xf32, #tpu.memory_space<vmem>>, %arg7: memref<32x32xbf16, #tpu.memory_space<vmem>>, %arg8: memref<1x32xf32, #tpu.memory_space<vmem>>, %arg9: memref<16x32xf32, #tpu.memory_space<vmem>>) attributes {dimension_semantics = [#tpu.dimension_semantics<parallel>], iteration_bounds = array<i64: 1>, scalar_prefetch = 0 : i64, scratch_operands = 0 : i64, tpu.core_type = #tpu.core_type<tc>, window_params = [{transform_indices = @transform_0, window_bounds = array<i64: 16, 32>}, {transform_indices = @transform_1, window_bounds = array<i64: 16, 96>}, {pipeline_mode = #tpu.pipeline_mode<synchronous>, transform_indices = @transform_2, window_bounds = array<i64: 96, 64>}, {pipeline_mode = #tpu.pipeline_mode<synchronous>, transform_indices = @transform_3, window_bounds = array<i64: 1, 64>}, {pipeline_mode = #tpu.pipeline_mode<synchronous>, transform_indices = @transform_4, window_bounds = array<i64: 32, 32>}, {pipeline_mode = #tpu.pipeline_mode<synchronous>, transform_indices = @transform_5, window_bounds = array<i64: 1, 32>}, {pipeline_mode = #tpu.pipeline_mode<synchronous>, transform_indices = @transform_6, window_bounds = array<i64: 32, 32>}, {pipeline_mode = #tpu.pipeline_mode<synchronous>, transform_indices = @transform_7, window_bounds = array<i64: 1, 32>}, {transform_indices = @transform_8, window_bounds = array<i64: 16, 32>}]} {
    %c0 = arith.constant 0 : index
    %c0_0 = arith.constant 0 : index
    %0 = vector.load %arg1[%c0, %c0_0] : memref<16x32xf32, #tpu.memory_space<vmem>>, vector<16x32xf32>
    %c0_1 = arith.constant 0 : index
    %c0_2 = arith.constant 0 : index
    %1 = vector.load %arg2[%c0_1, %c0_2] : memref<16x96xbf16, #tpu.memory_space<vmem>>, vector<16x96xbf16>
    %c0_3 = arith.constant 0 : index
    %c0_4 = arith.constant 0 : index
    %2 = vector.load %arg3[%c0_3, %c0_4] : memref<96x64xbf16, #tpu.memory_space<vmem>>, vector<96x64xbf16>
    %cst = arith.constant dense<0.000000e+00> : vector<16x64xf32>
    %3 = tpu.matmul %1, %2, %cst {dimension_numbers = #tpu.dot_dimension_numbers<[1], [0], [0], [1], [0, 0, 1, 1], [], []>} : vector<16x96xbf16>, vector<96x64xbf16>, vector<16x64xf32> -> vector<16x64xf32>
    %c0_5 = arith.constant 0 : index
    %c0_6 = arith.constant 0 : index
    %4 = vector.load %arg4[%c0_5, %c0_6] : memref<1x64xf32, #tpu.memory_space<vmem>>, vector<1x64xf32>
    %5 = vector.broadcast %4 : vector<1x64xf32> to vector<16x64xf32>
    %6 = arith.addf %3, %5 : vector<16x64xf32>
    %cst_7 = arith.constant 0.000000e+00 : f32
    %7 = vector.broadcast %cst_7 : f32 to vector<16x64xf32>
    %8 = arith.maximumf %6, %7 : vector<16x64xf32>
    %9 = arith.truncf %8 : vector<16x64xf32> to vector<16x64xbf16>
    %10 = vector.extract_strided_slice %9 {offsets = [0, 0], sizes = [16, 32], strides = [1, 1]} : vector<16x64xbf16> to vector<16x32xbf16>
    %c0_8 = arith.constant 0 : index
    %c0_9 = arith.constant 0 : index
    %11 = vector.load %arg5[%c0_8, %c0_9] : memref<32x32xbf16, #tpu.memory_space<vmem>>, vector<32x32xbf16>
    %cst_10 = arith.constant dense<0.000000e+00> : vector<16x32xf32>
    %12 = tpu.matmul %10, %11, %cst_10 {dimension_numbers = #tpu.dot_dimension_numbers<[1], [0], [0], [1], [0, 0, 1, 1], [], []>} : vector<16x32xbf16>, vector<32x32xbf16>, vector<16x32xf32> -> vector<16x32xf32>
    %c0_11 = arith.constant 0 : index
    %c0_12 = arith.constant 0 : index
    %13 = vector.load %arg6[%c0_11, %c0_12] : memref<1x32xf32, #tpu.memory_space<vmem>>, vector<1x32xf32>
    %14 = vector.broadcast %13 : vector<1x32xf32> to vector<16x32xf32>
    %15 = arith.addf %12, %14 : vector<16x32xf32>
    %16 = vector.extract_strided_slice %9 {offsets = [0, 32], sizes = [16, 32], strides = [1, 1]} : vector<16x64xbf16> to vector<16x32xbf16>
    %c0_13 = arith.constant 0 : index
    %c0_14 = arith.constant 0 : index
    %17 = vector.load %arg7[%c0_13, %c0_14] : memref<32x32xbf16, #tpu.memory_space<vmem>>, vector<32x32xbf16>
    %cst_15 = arith.constant dense<0.000000e+00> : vector<16x32xf32>
    %18 = tpu.matmul %16, %17, %cst_15 {dimension_numbers = #tpu.dot_dimension_numbers<[1], [0], [0], [1], [0, 0, 1, 1], [], []>} : vector<16x32xbf16>, vector<32x32xbf16>, vector<16x32xf32> -> vector<16x32xf32>
    %c0_16 = arith.constant 0 : index
    %c0_17 = arith.constant 0 : index
    %19 = vector.load %arg8[%c0_16, %c0_17] : memref<1x32xf32, #tpu.memory_space<vmem>>, vector<1x32xf32>
    %20 = vector.broadcast %19 : vector<1x32xf32> to vector<16x32xf32>
    %21 = arith.addf %18, %20 : vector<16x32xf32>
    %cst_18 = arith.constant dense<0.000000e+00> : vector<16xf32>
    %22 = vector.multi_reduction <add>, %0, %cst_18 [1] : vector<16x32xf32> to vector<16xf32>
    %23 = vector.shape_cast %22 : vector<16xf32> to vector<16x1xf32>
    %cst_19 = arith.constant 3.200000e+01 : f32
    %24 = vector.broadcast %cst_19 : f32 to vector<16x1xf32>
    %25 = arith.divf %23, %24 : vector<16x1xf32>
    %26 = vector.broadcast %25 : vector<16x1xf32> to vector<16x32xf32>
    %27 = arith.subf %0, %26 : vector<16x32xf32>
    %28 = arith.mulf %27, %27 : vector<16x32xf32>
    %cst_20 = arith.constant dense<0.000000e+00> : vector<16xf32>
    %29 = vector.multi_reduction <add>, %28, %cst_20 [1] : vector<16x32xf32> to vector<16xf32>
    %30 = vector.shape_cast %29 : vector<16xf32> to vector<16x1xf32>
    %cst_21 = arith.constant 3.100000e+01 : f32
    %31 = vector.broadcast %cst_21 : f32 to vector<16x1xf32>
    %32 = arith.divf %30, %31 : vector<16x1xf32>
    %33 = math.sqrt %32 : vector<16x1xf32>
    %cst_22 = arith.constant 9.99999997E-7 : f32
    %34 = vector.broadcast %cst_22 : f32 to vector<16x1xf32>
    %35 = arith.addf %33, %34 : vector<16x1xf32>
    %36 = tpu.reciprocal %35 : vector<16x1xf32> -> vector<16x1xf32>
    %37 = arith.mulf %15, %27 : vector<16x32xf32>
    %38 = vector.broadcast %36 : vector<16x1xf32> to vector<16x32xf32>
    %39 = arith.mulf %37, %38 : vector<16x32xf32>
    %40 = arith.addf %39, %21 : vector<16x32xf32>
    %c0_23 = arith.constant 0 : index
    %c0_24 = arith.constant 0 : index
    %41 = vector.load %arg9[%c0_23, %c0_24] : memref<16x32xf32, #tpu.memory_space<vmem>>, vector<16x32xf32>
    tpu.vector_store %arg9[%c0_23, %c0_24], %40 {strides = array<i32>} : memref<16x32xf32, #tpu.memory_space<vmem>>, vector<16x32xf32>,
    return
  }
  func.func @transform_0(%arg0: i32) -> (i32, i32) {
    %c0_i32 = arith.constant 0 : i32
    %c0_i32_0 = arith.constant 0 : i32
    return %arg0, %c0_i32 : i32, i32
  }
  func.func @transform_1(%arg0: i32) -> (i32, i32) {
    %c0_i32 = arith.constant 0 : i32
    %c0_i32_0 = arith.constant 0 : i32
    return %arg0, %c0_i32 : i32, i32
  }
  func.func @transform_2(%arg0: i32) -> (i32, i32) {
    %c0_i32 = arith.constant 0 : i32
    %c0_i32_0 = arith.constant 0 : i32
    %c0_i32_1 = arith.constant 0 : i32
    return %c0_i32, %c0_i32_0 : i32, i32
  }
  func.func @transform_3(%arg0: i32) -> (i32, i32) {
    %c0_i32 = arith.constant 0 : i32
    %c0_i32_0 = arith.constant 0 : i32
    %c0_i32_1 = arith.constant 0 : i32
    return %c0_i32, %c0_i32_0 : i32, i32
  }
  func.func @transform_4(%arg0: i32) -> (i32, i32) {
    %c0_i32 = arith.constant 0 : i32
    %c0_i32_0 = arith.constant 0 : i32
    %c0_i32_1 = arith.constant 0 : i32
    return %c0_i32, %c0_i32_0 : i32, i32
  }
  func.func @transform_5(%arg0: i32) -> (i32, i32) {
    %c0_i32 = arith.constant 0 : i32
    %c0_i32_0 = arith.constant 0 : i32
    %c0_i32_1 = arith.constant 0 : i32
    return %c0_i32, %c0_i32_0 : i32, i32
  }
  func.func @transform_6(%arg0: i32) -> (i32, i32) {
    %c0_i32 = arith.constant 0 : i32
    %c0_i32_0 = arith.constant 0 : i32
    %c0_i32_1 = arith.constant 0 : i32
    return %c0_i32, %c0_i32_0 : i32, i32
  }
  func.func @transform_7(%arg0: i32) -> (i32, i32) {
    %c0_i32 = arith.constant 0 : i32
    %c0_i32_0 = arith.constant 0 : i32
    %c0_i32_1 = arith.constant 0 : i32
    return %c0_i32, %c0_i32_0 : i32, i32
  }
  func.func @transform_8(%arg0: i32) -> (i32, i32) {
    %c0_i32 = arith.constant 0 : i32
    %c0_i32_0 = arith.constant 0 : i32
    return %arg0, %c0_i32 : i32, i32
  }
}

</mosaic_0001>

<bundles_post_ra>
// kernel: tpu_custom_call.1
= control target key start
LH: loop header
LB: loop body
LE: loop exit
PB: predicated region body
PF: predicated region fallthrough
CT: control target
= control target key end

     0   :  { %v456_v1 = vmov 0.0   ;;  %vm457_vm0 = vmmov 0   ;;  %s578_s0 = inlined_call_operand.vmem [shape: f32[16,32], index: 0, kind: input, shape index: {}]   ;;  %s579_s1 = inlined_call_operand.vmem [shape: bf16[16,96], index: 1, kind: input, shape index: {}]   ;;  %s580_s2 = inlined_call_operand.vmem [shape: bf16[96,64], index: 2, kind: input, shape index: {}]   ;;  %s581_s3 = inlined_call_operand.vmem [shape: f32[1,64], index: 3, kind: input, shape index: {}]   ;;  %s582_s4 = inlined_call_operand.vmem [shape: bf16[32,32], index: 4, kind: input, shape index: {}]   ;;  %s583_s5 = inlined_call_operand.vmem [shape: f32[1,32], index: 5, kind: input, shape index: {}]   ;;  %s584_s6 = inlined_call_operand.vmem [shape: bf16[32,32], index: 6, kind: input, shape index: {}]   ;;  %s585_s7 = inlined_call_operand.vmem [shape: f32[1,32], index: 7, kind: input, shape index: {}]   ;;  %s586_s8 = inlined_call_operand.hbm [shape: f32[16,32], index: 8, kind: output, shape index: {}]  }
   0x1   :  { %v413_v0 = vld [vmem:[%s580_s2] sm:$0xff]   ;;  %375 = vmatprep.subr.bf16.mxu0 %v456_v1  ;;  %391 = vmatprep.subr.bf16.mxu1 %v456_v1  ;;  %v414_v2 = vld [vmem:[%s580_s2 + $0x8] sm:$0xff]   ;;  %v415_v3 = vld [vmem:[%s580_s2 + $0x10] sm:$0xff]  }
   0x2   :  { %376 = vmatpush3.bf16.msra.mxu0 %v413_v0  ;;  %387 = vmatprep.mubr.msk.bf16.mxu0 %vm457_vm0, %v456_v1  ;;  %v416_v4 = vld [vmem:[%s580_s2 + $0x18] sm:$0xff]  }
   0x3   :  { %377 = vmatprep.subr.bf16.mxu0 %v456_v1  ;;  %395 = vmatprep.mubr.msk.bf16.mxu1 %vm457_vm0, %v456_v1 }
   0x6   :  { %378 = vmatpush3.bf16.msra.mxu0 %v414_v2 }
   0x7   :  { %379 = vmatprep.subr.bf16.mxu0 %v456_v1 }
   0xa   :  { %380 = vmatpush3.bf16.msra.mxu0 %v415_v3 }
   0xb   :  { %13 = vsyncpa [#allocation3], 0  ;;  %381 = vmatprep.subr.bf16.mxu0 %v456_v1  ;;  %v417_v5 = vld [vmem:[%s580_s2 + $0x20] sm:$0xff]   ;;  %v418_v6 = vld [vmem:[%s580_s2 + $0x28] sm:$0xff]   ;;  %vm95_vm1 = vcmask 785408   ;;  %vm166_vm2 = vcmask 261120  }
   0xc   :  { %v419_v7 = vld [vmem:[%s579_s1] sm:$0xff]   ;;  %v421_v9 = vld [vmem:[%s582_s4 + $0x8] sm:$0xff]   ;;  %s458_s26 = smov 96   ;;  %s459_s9 = smov [#allocation2]  }
   0xd   :  { %v420_v8 = vld [vmem:[%s582_s4] sm:$0xff]   ;;  %v32_v10 = vld [vmem:[%s578_s0 + $0x8] sm:$0xff]  ;;  %s334_s10 = sshll.u32 %s459_s9, 4  ;;  %s335_s10 = int_to_ptr.vmem [resolvable:$true] %s334_s10 }
   0xe   :  { %382 = vmatpush3.bf16.msra.mxu0 %v416_v4  ;;  %392 = vmatpush3.bf16.msra.mxu1 %v420_v8  ;;  %v284_v11 = vsel %vm166_vm2, %v32_v10, 0.0  ;;  %v345_v12 = vld [vmem:[%s581_s3] ss:$0 sm:$0xff]  ;;  %v423_v23 = vld [vmem:[%s584_s6 + $0x8] sm:$0xff]   ;;  %s432_s11 = scalar_lea.vmem %s335_s10, 256  ;;  %p437_p1 = scmp.lt.s32.totalorder %s335_s10, %s335_s10 }
   0xf   :  { %383 = vmatprep.subr.bf16.mxu0 %v456_v1  ;;  %393 = vmatprep.subr.bf16.mxu1 %v456_v1  ;;  %v422_v21 = vld [vmem:[%s584_s6] sm:$0xff]   ;;  %p433_p0 = scmp.ne.s32.totalorder %s335_s10, %s432_s11  ;;  %p438_p2 = scmp.lt.s32.totalorder %s432_s11, %s432_s11 }
  0x10   :  { %285 = vadd.xlane.f32.xlu1 %v284_v11  ;;  %v31_v24 = vld [vmem:[%s578_s0] sm:$0xff] }
  0x11   :  { %v281_v25 = vsel %vm166_vm2, %v31_v24, 0.0  ;;  %v354_v37 = vld [vmem:[%s583_s5] ss:$0 sm:$0xff]  ;;  %p439_p3 = por %p438_p2, %p437_p1 }
  0x12   :  { %384 = vmatpush3.bf16.msra.mxu0 %v417_v5  ;;  %394 = vmatpush3.bf16.msra.mxu1 %v421_v9  ;;  %v358_v0 = vld [vmem:[%s585_s7] ss:$0 sm:$0xff] }
  0x13   :  { %385 = vmatprep.subr.bf16.mxu0 %v456_v1  ;;  %399 = vmatprep.subr.bf16.mxu1 %v456_v1  ;;  %p440_p4 = pnand %p439_p3, %p433_p0 }
  0x16   :  { %386 = vmatpush3.bf16.msra.mxu0 %v418_v6 }
  0x19   :  { %388 = vmatmul.mubr.msk.bf16.vlgmr.msra.gmra.mrb[0].mxu0 %vm95_vm1, %v419_v7 }
  0x9d   :  { %v286_v27 = vpop.xlane.xlu1 %285 }
  0x9e   :  { %v289_v28 = vmul.f32 0.03125, %v286_v27 }
  0xa0   :  { %v291_v31 = vsub.f32 %v32_v10, %v289_v28 }
  0xa2   :  { %v293_v34 = vmul.f32 %v291_v31, %v291_v31 }
  0xa4   :  { %v297_v36 = vsel %vm166_vm2, %v293_v34, 0.0 }
  0xec   :  { %v133_v13 = vpop.f32.mrb[0].mxu0 }
  0xed   :  { %v134_v14 = vadd.f32 %v345_v12, %v133_v13  ;;  %v389_v15 = vpop.f32.mrb[1].mxu0 }
  0xee   :  { %v136_v16 = vpop.f32.mrb[2].mxu0 }
  0xef   :  { %v137_v17 = vadd.f32 %v345_v12, %v136_v16  ;;  %v390_v18 = vpop.f32.mrb[3].mxu0  ;;  %v140_v19 = vmax.f32 %v134_v14, 0.0 }
  0xf1   :  { %v141_v20 = vmax.f32 %v137_v17, 0.0 }
  0xf3   :  { %v142_v22 = vpack.c.bf16 %v141_v20, %v140_v19 }
  0xf5   :  { %223 = vrot.lane.b32.xlu0 %v142_v22, %s458_s26  ;;  %396 = vmatmul.mubr.msk.bf16.vlgmr.msra.gmra.mrb[0].mxu1 %vm166_vm2, %v142_v22 }
  0xf6   :  { %400 = vmatpush3.bf16.msra.mxu1 %v422_v21  ;;  %403 = vmatprep.mubr.msk.bf16.mxu1 %vm457_vm0, %v456_v1 }
  0xf7   :  { %401 = vmatprep.subr.bf16.mxu1 %v456_v1 }
  0xfa   :  { %402 = vmatpush3.bf16.msra.mxu1 %v423_v23 }
 0x114   :  { %282 = vadd.xlane.f32.xlu0 %v281_v25 }
 0x167   :  { %v224_v26 = vpop.permute.xlu0 %223 }
 0x168   :  { %404 = vmatmul.mubr.msk.bf16.vlgmr.msra.gmra.mrb[4].mxu1 %vm166_vm2, %v224_v26 }
 0x1a1   :  { %v283_v29 = vpop.xlane.xlu0 %282 }
 0x1a2   :  { %v288_v30 = vmul.f32 0.03125, %v283_v29 }
 0x1a4   :  { %v290_v32 = vsub.f32 %v31_v24, %v288_v30 }
 0x1a6   :  { %v292_v33 = vmul.f32 %v290_v32, %v290_v32 }
 0x1a8   :  { %v294_v35 = vsel %vm166_vm2, %v292_v33, 0.0 }
 0x1a9   :  { %295 = vadd.xlane.f32.xlu1 %v294_v35 }
 0x1ad   :  { %298 = vadd.xlane.f32.xlu1 %v297_v36 }
 0x1c8   :  { %v204_v38 = vpop.f32.mrb[0].mxu1 }
 0x1c9   :  { %v205_v39 = vadd.f32 %v354_v37, %v204_v38  ;;  %v397_v40 = vpop.f32.mrb[1].mxu1 }
 0x1ca   :  { %v207_v41 = vpop.f32.mrb[2].mxu1 }
 0x1cb   :  { %v321_v42 = vmul.f32 %v290_v32, %v205_v39  ;;  %v398_v43 = vpop.f32.mrb[3].mxu1  ;;  %v208_v1 = vadd.f32 %v354_v37, %v207_v41 }
 0x1cd   :  { %v322_v5 = vmul.f32 %v291_v31, %v208_v1 }
 0x236   :  { %v296_v44 = vpop.xlane.xlu1 %295 }
 0x237   :  { %v301_v45 = vmul.f32 0.032258064, %v296_v44 }
 0x239   :  { %424 = vrsqrt.f32 %v301_v45  ;;  %vm305_vm3 = vcmp.eq.f32.partialorder %v301_v45, inf  ;;  %v308_v54 = vand.u32 2147483648, %v301_v45  ;;  %vm307_vm4 = vcmp.eq.f32.partialorder %v301_v45, 0.0 }
 0x23a   :  { %v299_v46 = vpop.xlane.xlu1 %298 }
 0x23b   :  { %v302_v47 = vmul.f32 0.032258064, %v299_v46  ;;  %v274_v48 = vpop.f32.mrb[4].mxu1 }
 0x23c   :  { %v405_v49 = vpop.f32.mrb[5].mxu1  ;;  %v275_v3 = vadd.f32 %v358_v0, %v274_v48 }
 0x23d   :  { %426 = vrsqrt.f32 %v302_v47  ;;  %v277_v50 = vpop.f32.mrb[6].mxu1  ;;  %vm312_vm5 = vcmp.eq.f32.partialorder %v302_v47, inf  ;;  %v315_v60 = vand.u32 2147483648, %v302_v47  ;;  %vm314_vm6 = vcmp.eq.f32.partialorder %v302_v47, 0.0 }
 0x23e   :  { %v406_v51 = vpop.f32.mrb[7].mxu1  ;;  %v278_v8 = vadd.f32 %v358_v0, %v277_v50 }
 0x243   :  { %v425_v52 = vpop.eup %424 }
 0x244   :  { %v304_v53 = vmul.f32 %v425_v52, %v301_v45 }
 0x246   :  { %v306_v55 = vsel %vm305_vm3, %v301_v45, %v304_v53 }
 0x247   :  { %v427_v56 = vpop.eup %426  ;;  %v309_v57 = vsel %vm307_vm4, %v308_v54, %v306_v55 }
 0x248   :  { %v311_v58 = vmul.f32 %v427_v56, %v302_v47  ;;  %v317_v59 = vadd.f32 1e-06, %v309_v57 }
 0x24a   :  { %v313_v61 = vsel %vm312_vm5, %v302_v47, %v311_v58  ;;  %428 = vrcp.f32 %v317_v59 }
 0x24b   :  { %v316_v62 = vsel %vm314_vm6, %v315_v60, %v313_v61 }
 0x24c   :  { %v318_v63 = vadd.f32 1e-06, %v316_v62 }
 0x24e   :  { %430 = vrcp.f32 %v318_v63 }
 0x254   :  { %v429_v2 = vpop.eup %428 }
 0x255   :  { %v323_v4 = vmul.f32 %v429_v2, %v321_v42 }
 0x257   :  { %v325_v6 = vadd.f32 %v323_v4, %v275_v3 }
 0x258   :  { %v431_v7 = vpop.eup %430 }
 0x259   :  { %327 = vst.msk [vmem:[#allocation2] sm:$0xff] %vm166_vm2, %v325_v6  ;;  %v324_v9 = vmul.f32 %v431_v7, %v322_v5 }
 0x25b   :  { %v326_v10 = vadd.f32 %v324_v9, %v278_v8 }
 0x25d   :  { %328 = vst.msk [vmem:[#allocation2 + $0x8] sm:$0xff] %vm166_vm2, %v326_v10 }
 0x25e   :  { %443 = shalt.err (!%p440_p4)
}
 0x25f   :  { %s444_s13 = scalar_lea.hbm %s586_s8, 256 }
 0x260   :  { %p445_p5 = scmp.ne.s32.totalorder %s586_s8, %s444_s13  ;;  %p448_p6 = scmp.lt.u32.totalorder %s444_s13, %s586_s8 }
 0x262   :  { %p450_p7 = pnand %p448_p6, %p445_p5 }
 0x264   :  { %453 = shalt.err (!%p450_p7)
}
 0x265   :  { %s460_s18 = smov 128   ;;  %s461_s19 = smov 8  }
 0x266   :  { %340 = dma.vmem_to_hbm [thread:$0]  %s335_s10, 256, %s586_s8, [#allocation3], %s460_s18, %s460_s18, %s461_s19  }
 0x267   :  { %454 = dma.done.wait [#allocation3], 256  }
 0x268   :  { %455 = vsyncadd [#allocation3], 4294967040 }
 0x269   :  { %344 = vsyncpa [#allocation3], 1 }

</bundles_post_ra>
